<compile_context>
chip_gen: v6e
topology: v6e:2x2x1
jax: 0.10.0
libtpu: 0.0.40
codegen_flags: <defaults>
</compile_context>

<pallas_src>
import jax
import jax.numpy as jnp
from jax.experimental import pallas as pl
from jax.experimental.pallas import tpu as pltpu


def _get_positional_embeddings(max_len: int, d_model: int) -> jnp.ndarray:
    """Deterministic parameter construction, mirroring the PyTorch __init__."""
    position = jnp.arange(0, max_len, dtype=jnp.float32)[:, None]            # (L, 1)
    div_term = jnp.exp(
        jnp.arange(0, d_model, 2, dtype=jnp.float32)
        * -(jnp.log(jnp.float32(10000.0)) / d_model)
    )                                                                         # (ceil(D/2),)
    angles = position * div_term                                              # (L, ceil(D/2))
    pe = jnp.zeros((max_len, d_model), dtype=jnp.float32)
    pe = pe.at[:, 0::2].set(jnp.sin(angles))
    pe = pe.at[:, 1::2].set(jnp.cos(angles[:, : d_model // 2]))               # guards odd D
    # unsqueeze(0).transpose(0, 1) -> (max_len, 1, d_model)
    return pe[:, None, :]


def _add_pe_kernel(x_ref, pe_ref, o_ref):
    # x_ref : (TILE_S, TILE_B, D) tile in VMEM
    # pe_ref: (TILE_S, 1,      D) tile in VMEM -> broadcast over batch (VPU add)
    o_ref[...] = (x_ref[...] + pe_ref[...]).astype(o_ref.dtype)


def _round_down(v: int, m: int) -> int:
    return (v // m) * m


def _choose_tiles(S: int, B: int, D: int, itemsize: int):
    """Pick (tile_s, tile_b) so padded, double-buffered VMEM stays ~<= 8 MiB."""
    # Batch tile: full B if small (a block dim equal to the full array dim is
    # always legal); otherwise a multiple of 8 (sublane granularity), capped.
    if B <= 8:
        tile_b = B
    else:
        tile_b = min(_round_down(B, 8), 64)

    # Padded sublane extents: second-to-last tile dims pad to 8 in VMEM.
    pad_b = max(8, tile_b)        # x / out tiles
    pad_pe = 8                    # PE tile's size-1 batch dim pads to 8

    vmem_budget = 8 * 1024 * 1024                    # total, double-buffered
    bytes_per_seq_row = 2 * (2 * pad_b + pad_pe) * D * itemsize   # 2 buffers
    tile_s = max(8, _round_down(vmem_budget // max(1, bytes_per_seq_row), 8))
    tile_s = min(tile_s, 512)     # per-step overhead (~0.35 us) amortized long before this
    if tile_s >= S:
        tile_s = S                # full-dim block is always legal (covers S < 8 too)
    return tile_s, tile_b


_PALLAS_MIN_BYTES = 1 << 20  # below this, a fused XLA add beats a custom call


def positional_encoding_forward(
    x: jnp.ndarray, pos_embedding: jnp.ndarray, *, force_pallas: bool = False
) -> jnp.ndarray:
    """x: (seq, batch, d_model); pos_embedding: (max_len, 1, d_model)."""
    S, B, D = x.shape
    pe_slice = pos_embedding[:S].astype(x.dtype)      # (S, 1, D), same dtype as x

    if not force_pallas and x.size * x.dtype.itemsize < _PALLAS_MIN_BYTES:
        # Kernel-launch overhead dwarfs the work at this scale on every TPU gen.
        return x + pe_slice

    tile_s, tile_b = _choose_tiles(S, B, D, x.dtype.itemsize)
    grid = (pl.cdiv(S, tile_s), pl.cdiv(B, tile_b))

    return pl.pallas_call(
        _add_pe_kernel,
        out_shape=jax.ShapeDtypeStruct((S, B, D), x.dtype),
        grid=grid,
        in_specs=[
            # x: tiled over (seq, batch); D (lane dim) kept whole and dense.
            pl.BlockSpec((tile_s, tile_b, D), lambda si, bi: (si, bi, 0)),
            # PE: index_map ignores the batch grid axis -> one DMA per seq
            # tile, reused across the inner batch steps (resident block).
            pl.BlockSpec((tile_s, 1, D), lambda si, bi: (si, 0, 0)),
        ],
        out_specs=pl.BlockSpec((tile_s, tile_b, D), lambda si, bi: (si, bi, 0)),
        # Output reuses x's HBM buffer (XLA inserts a copy only if x stays live).
        input_output_aliases={0: 0},
        compiler_params=pltpu.CompilerParams(
            dimension_semantics=("parallel", "parallel"),
        ),
    )(x, pe_slice)


if __name__ == "__main__":
    # Small shapes consistent with the module spec (d_model=512 in main.py).
    seq_len, batch, d_model, max_len = 16, 2, 512, 64

    pos_embedding = _get_positional_embeddings(max_len, d_model)

    key = jax.random.PRNGKey(0)
    x = jax.random.normal(key, (seq_len, batch, d_model), dtype=jnp.float32)

    # Reference (pure JAX, mirrors the PyTorch forward exactly); computed
    # before the kernel call since the kernel output aliases x's buffer.
    ref = jax.block_until_ready(x + pos_embedding[:seq_len, :])

    out = positional_encoding_forward(x, pos_embedding, force_pallas=True)
    out = jax.block_until_ready(out)

    assert out.shape == (seq_len, batch, d_model)
    assert jnp.allclose(out, ref, atol=1e-6, rtol=1e-6)

    print("KERNEL_OK")
</pallas_src>

<mosaic_0001>
module attributes {stable_mosaic.version = 11 : i64} {
  func.func @_add_pe_kernel(%arg0: i32, %arg1: i32, %arg2: memref<16x2x512xf32, #tpu.memory_space<vmem>>, %arg3: memref<16x1x512xf32, #tpu.memory_space<vmem>>, %arg4: memref<16x2x512xf32, #tpu.memory_space<vmem>>) attributes {dimension_semantics = [#tpu.dimension_semantics<parallel>, #tpu.dimension_semantics<parallel>], iteration_bounds = array<i64: 1, 1>, scalar_prefetch = 0 : i64, scratch_operands = 0 : i64, tpu.core_type = #tpu.core_type<tc>, window_params = [{transform_indices = @transform_0, window_bounds = array<i64: 16, 2, 512>}, {transform_indices = @transform_1, window_bounds = array<i64: 16, 1, 512>}, {transform_indices = @transform_2, window_bounds = array<i64: 16, 2, 512>}]} {
    %c0 = arith.constant 0 : index
    %c0_0 = arith.constant 0 : index
    %c0_1 = arith.constant 0 : index
    %0 = vector.load %arg2[%c0, %c0_0, %c0_1] : memref<16x2x512xf32, #tpu.memory_space<vmem>>, vector<16x2x512xf32>
    %c0_2 = arith.constant 0 : index
    %c0_3 = arith.constant 0 : index
    %c0_4 = arith.constant 0 : index
    %1 = vector.load %arg3[%c0_2, %c0_3, %c0_4] : memref<16x1x512xf32, #tpu.memory_space<vmem>>, vector<16x1x512xf32>
    %2 = vector.broadcast %1 : vector<16x1x512xf32> to vector<16x2x512xf32>
    %3 = arith.addf %0, %2 : vector<16x2x512xf32>
    %c0_5 = arith.constant 0 : index
    %c0_6 = arith.constant 0 : index
    %c0_7 = arith.constant 0 : index
    %4 = vector.load %arg4[%c0_5, %c0_6, %c0_7] : memref<16x2x512xf32, #tpu.memory_space<vmem>>, vector<16x2x512xf32>
    tpu.vector_store %arg4[%c0_5, %c0_6, %c0_7], %3 {strides = array<i32>} : memref<16x2x512xf32, #tpu.memory_space<vmem>>, vector<16x2x512xf32>,
    return
  }
  func.func @transform_0(%arg0: i32, %arg1: i32) -> (i32, i32, i32) {
    %c0_i32 = arith.constant 0 : i32
    %c0_i32_0 = arith.constant 0 : i32
    return %arg0, %arg1, %c0_i32 : i32, i32, i32
  }
  func.func @transform_1(%arg0: i32, %arg1: i32) -> (i32, i32, i32) {
    %c0_i32 = arith.constant 0 : i32
    %c0_i32_0 = arith.constant 0 : i32
    %c0_i32_1 = arith.constant 0 : i32
    return %arg0, %c0_i32, %c0_i32_0 : i32, i32, i32
  }
  func.func @transform_2(%arg0: i32, %arg1: i32) -> (i32, i32, i32) {
    %c0_i32 = arith.constant 0 : i32
    %c0_i32_0 = arith.constant 0 : i32
    return %arg0, %arg1, %c0_i32 : i32, i32, i32
  }
}

</mosaic_0001>

<bundles_post_ra>
// kernel: tpu_custom_call.1
= control target key start
LH: loop header
LB: loop body
LE: loop exit
PB: predicated region body
PF: predicated region fallthrough
CT: control target
= control target key end

     0   :  { %7 = vsyncpa [#allocation3], 0  ;;  %s902_s0 = inlined_call_operand.hbm [shape: f32[16,2,512], index: 0, kind: input, shape index: {}, may-alias: {0,2}]   ;;  %s903_s1 = inlined_call_operand.vmem [shape: f32[16,1,512], index: 1, kind: input, shape index: {}]   ;;  %s904_s2 = inlined_call_operand.hbm [shape: f32[16,2,512], index: 2, kind: output, shape index: {}, may-alias: {0,2}]  }
   0x1   :  { %8 = vsyncpa [#allocation4], 0  ;;  %s716_s9 = smov [#allocation2]  }
   0x2   :  { %s14_s10 = sshll.u32 %s716_s9, 4  ;;  %s15_s10 = int_to_ptr.vmem [resolvable:$true] %s14_s10 }
   0x3   :  { %s680_s11 = scalar_lea.vmem %s15_s10, 2048  ;;  %p685_p1 = scmp.lt.s32.totalorder %s15_s10, %s15_s10 }
   0x4   :  { %p681_p0 = scmp.ne.s32.totalorder %s15_s10, %s680_s11  ;;  %p686_p2 = scmp.lt.s32.totalorder %s680_s11, %s680_s11 }
   0x6   :  { %p687_p3 = por %p686_p2, %p685_p1 }
   0x8   :  { %p688_p4 = pnand %p687_p3, %p681_p0 }
   0xa   :  { %691 = shalt.err (!%p688_p4)
}
   0xb   :  { %s717_s12 = smov 128   ;;  %s718_s13 = smov 8  }
   0xc   :  { %20 = dma.hbm_to_vmem [thread:$0]  %s902_s0, 2048, %s15_s10, [#allocation3], %s717_s12, %s717_s12, %s718_s13  }
   0xd   :  { %712 = dma.done.wait [#allocation3], 2048  }
   0xe   :  { %713 = vsyncadd [#allocation3], 4294965248  ;;  %v74_v0 = vlaneseq  ;;  %v719_v1 = vmov 1983009808   ;;  %v42_v9 = vld [vmem:[%s903_s1] sm:$0xf] }
   0xf   :  { %v333_v2 = vunpack.c.l.s4 %v719_v1  ;;  %v43_v15 = vld [vmem:[%s903_s1 + $0x4] sm:$0xf]  ;;  %v44_v16 = vld [vmem:[%s903_s1 + $0x8] sm:$0xf]  ;;  %v45_v21 = vld [vmem:[%s903_s1 + $0xc] sm:$0xf] }
  0x10   :  { %v75_v3 = vshrl.u32 %v74_v0, 7  ;;  %v46_v34 = vld [vmem:[%s903_s1 + $0x10] sm:$0xf]  ;;  %v26_v35 = vld [vmem:[#allocation2] sm:$0xff]  ;;  %v27_v41 = vld [vmem:[#allocation2 + $0x8] sm:$0xff] }
  0x11   :  { %v334_v4 = vunpack.c.0.s8 %v333_v2  ;;  %v47_v49 = vld [vmem:[%s903_s1 + $0x14] sm:$0xf]  ;;  %v48_v59 = vld [vmem:[%s903_s1 + $0x18] sm:$0xf] }
  0x12   :  { %v742_v5 = vsub.s32 0, %v75_v3  ;;  %v744_v6 = vsub.s32 1, %v75_v3  ;;  %v746_v7 = vsub.s32 2, %v75_v3  ;;  %v748_v8 = vsub.s32 3, %v75_v3  ;;  %v28_v51 = vld [vmem:[#allocation2 + $0x10] sm:$0xff]  ;;  %v29_v1 = vld [vmem:[#allocation2 + $0x18] sm:$0xff] }
  0x13   :  { %v753_v10 = vsub.s32 %v334_v4, %v75_v3 }
  0x14   :  { %v77_v11 = vrot.slane %v42_v9, %v742_v5  ;;  %v81_v12 = vrot.slane %v42_v9, %v744_v6  ;;  %v85_v13 = vrot.slane %v42_v9, %v746_v7  ;;  %v89_v14 = vrot.slane %v42_v9, %v748_v8  ;;  %v49_v9 = vld [vmem:[%s903_s1 + $0x1c] sm:$0xf] }
  0x15   :  { %v93_v17 = vrot.slane %v43_v15, %v742_v5  ;;  %v97_v18 = vrot.slane %v43_v15, %v744_v6  ;;  %v101_v19 = vrot.slane %v43_v15, %v746_v7  ;;  %v105_v20 = vrot.slane %v43_v15, %v748_v8 }
  0x16   :  { %v330_v22 = vcombine.low %v77_v11, %v81_v12  ;;  %v331_v23 = vcombine.low %v85_v13, %v89_v14  ;;  %v109_v24 = vrot.slane %v44_v16, %v742_v5  ;;  %v113_v25 = vrot.slane %v44_v16, %v744_v6 }
  0x17   :  { %v347_v26 = vcombine.low %v93_v17, %v97_v18  ;;  %v348_v27 = vcombine.low %v101_v19, %v105_v20  ;;  %v117_v28 = vrot.slane %v44_v16, %v746_v7  ;;  %v121_v29 = vrot.slane %v44_v16, %v748_v8  ;;  %v50_v19 = vld [vmem:[%s903_s1 + $0x20] sm:$0xf] }
  0x18   :  { %v338_v30 = vrot.slane %v330_v22, %v753_v10  ;;  %v345_v31 = vrot.slane %v331_v23, %v753_v10  ;;  %v364_v32 = vcombine.low %v109_v24, %v113_v25  ;;  %v125_v33 = vrot.slane %v45_v21, %v742_v5 }
  0x19   :  { %v355_v36 = vrot.slane %v347_v26, %v753_v10  ;;  %v362_v37 = vrot.slane %v348_v27, %v753_v10  ;;  %v365_v38 = vcombine.low %v117_v28, %v121_v29  ;;  %v129_v39 = vrot.slane %v45_v21, %v744_v6  ;;  %v31_v29 = vld [vmem:[#allocation2 + $0x28] sm:$0xff] }
  0x1a   :  { %v346_v40 = vcombine.low %v338_v30, %v345_v31  ;;  %v372_v42 = vrot.slane %v364_v32, %v753_v10  ;;  %v133_v43 = vrot.slane %v45_v21, %v746_v7  ;;  %v137_v44 = vrot.slane %v45_v21, %v748_v8  ;;  %v30_v21 = vld [vmem:[#allocation2 + $0x20] sm:$0xff] }
  0x1b   :  { %v363_v45 = vcombine.low %v355_v36, %v362_v37  ;;  %v379_v46 = vrot.slane %v365_v38, %v753_v10  ;;  %v381_v47 = vcombine.low %v125_v33, %v129_v39  ;;  %v141_v48 = vrot.slane %v46_v34, %v742_v5 }
  0x1c   :  { %v618_v50 = vadd.f32 %v346_v40, %v26_v35  ;;  %v382_v52 = vcombine.low %v133_v43, %v137_v44  ;;  %v145_v53 = vrot.slane %v46_v34, %v744_v6  ;;  %v149_v54 = vrot.slane %v46_v34, %v746_v7  ;;  %v52_v43 = vld [vmem:[%s903_s1 + $0x28] sm:$0xf] }
  0x1d   :  { %v619_v55 = vadd.f32 %v363_v45, %v27_v41  ;;  %v380_v56 = vcombine.low %v372_v42, %v379_v46  ;;  %v389_v57 = vrot.slane %v381_v47, %v753_v10  ;;  %v153_v58 = vrot.slane %v46_v34, %v748_v8  ;;  %v51_v34 = vld [vmem:[%s903_s1 + $0x24] sm:$0xf]  ;;  %v32_v45 = vld [vmem:[#allocation2 + $0x30] sm:$0xff] }
  0x1e   :  { %634 = vst [vmem:[#allocation5] sm:$0xff] %v618_v50  ;;  %v396_v60 = vrot.slane %v382_v52, %v753_v10  ;;  %v398_v61 = vcombine.low %v141_v48, %v145_v53  ;;  %v157_v62 = vrot.slane %v47_v49, %v742_v5  ;;  %v161_v63 = vrot.slane %v47_v49, %v744_v6  ;;  %v33_v53 = vld [vmem:[#allocation2 + $0x38] sm:$0xff] }
  0x1f   :  { %635 = vst [vmem:[#allocation5 + $0x8] sm:$0xff] %v619_v55  ;;  %v620_v0 = vadd.f32 %v380_v56, %v28_v51  ;;  %v399_v2 = vcombine.low %v149_v54, %v153_v58  ;;  %v165_v3 = vrot.slane %v47_v49, %v746_v7  ;;  %v169_v4 = vrot.slane %v47_v49, %v748_v8  ;;  %v53_v58 = vld [vmem:[%s903_s1 + $0x2c] sm:$0xf] }
  0x20   :  { %v397_v11 = vcombine.low %v389_v57, %v396_v60  ;;  %v406_v12 = vrot.slane %v398_v61, %v753_v10  ;;  %v415_v13 = vcombine.low %v157_v62, %v161_v63  ;;  %v173_v14 = vrot.slane %v48_v59, %v742_v5 }
  0x21   :  { %636 = vst [vmem:[#allocation5 + $0x10] sm:$0xff] %v620_v0  ;;  %v413_v15 = vrot.slane %v399_v2, %v753_v10  ;;  %v416_v16 = vcombine.low %v165_v3, %v169_v4  ;;  %v177_v17 = vrot.slane %v48_v59, %v744_v6  ;;  %v181_v18 = vrot.slane %v48_v59, %v746_v7  ;;  %v54_v3 = vld [vmem:[%s903_s1 + $0x30] sm:$0xf] }
  0x22   :  { %v621_v20 = vadd.f32 %v397_v11, %v29_v1  ;;  %v423_v22 = vrot.slane %v415_v13, %v753_v10  ;;  %v185_v23 = vrot.slane %v48_v59, %v748_v8  ;;  %v189_v24 = vrot.slane %v49_v9, %v742_v5 }
  0x23   :  { %v414_v25 = vcombine.low %v406_v12, %v413_v15  ;;  %v430_v26 = vrot.slane %v416_v16, %v753_v10  ;;  %v432_v27 = vcombine.low %v173_v14, %v177_v17  ;;  %v193_v28 = vrot.slane %v49_v9, %v744_v6 }
  0x24   :  { %637 = vst [vmem:[#allocation5 + $0x18] sm:$0xff] %v621_v20  ;;  %v433_v30 = vcombine.low %v181_v18, %v185_v23  ;;  %v197_v31 = vrot.slane %v49_v9, %v746_v7  ;;  %v201_v32 = vrot.slane %v49_v9, %v748_v8  ;;  %v205_v33 = vrot.slane %v50_v19, %v742_v5  ;;  %v34_v9 = vld [vmem:[#allocation2 + $0x40] sm:$0xff]  ;;  %v35_v18 = vld [vmem:[#allocation2 + $0x48] sm:$0xff]  ;;  %v55_v23 = vld [vmem:[%s903_s1 + $0x34] sm:$0xf] }
  0x25   :  { %v622_v35 = vadd.f32 %v414_v25, %v30_v21  ;;  %v431_v36 = vcombine.low %v423_v22, %v430_v26  ;;  %v440_v37 = vrot.slane %v432_v27, %v753_v10  ;;  %v449_v38 = vcombine.low %v189_v24, %v193_v28 }
  0x26   :  { %v447_v39 = vrot.slane %v433_v30, %v753_v10  ;;  %v450_v40 = vcombine.low %v197_v31, %v201_v32  ;;  %v209_v41 = vrot.slane %v50_v19, %v744_v6  ;;  %v213_v42 = vrot.slane %v50_v19, %v746_v7  ;;  %v56_v32 = vld [vmem:[%s903_s1 + $0x38] sm:$0xf] }
  0x27   :  { %638 = vst [vmem:[#allocation5 + $0x20] sm:$0xff] %v622_v35  ;;  %v623_v44 = vadd.f32 %v431_v36, %v31_v29  ;;  %v457_v46 = vrot.slane %v449_v38, %v753_v10  ;;  %v217_v47 = vrot.slane %v50_v19, %v748_v8  ;;  %v221_v48 = vrot.slane %v51_v34, %v742_v5 }
  0x28   :  { %v448_v49 = vcombine.low %v440_v37, %v447_v39  ;;  %v464_v50 = vrot.slane %v450_v40, %v753_v10  ;;  %v466_v51 = vcombine.low %v205_v33, %v209_v41  ;;  %v225_v52 = vrot.slane %v51_v34, %v744_v6 }
  0x29   :  { %639 = vst [vmem:[#allocation5 + $0x28] sm:$0xff] %v623_v44  ;;  %v467_v54 = vcombine.low %v213_v42, %v217_v47  ;;  %v229_v55 = vrot.slane %v51_v34, %v746_v7  ;;  %v233_v56 = vrot.slane %v51_v34, %v748_v8  ;;  %v237_v57 = vrot.slane %v52_v43, %v742_v5  ;;  %v36_v34 = vld [vmem:[#allocation2 + $0x50] sm:$0xff]  ;;  %v37_v42 = vld [vmem:[#allocation2 + $0x58] sm:$0xff] }
  0x2a   :  { %v624_v59 = vadd.f32 %v448_v49, %v32_v45  ;;  %v465_v60 = vcombine.low %v457_v46, %v464_v50  ;;  %v474_v61 = vrot.slane %v466_v51, %v753_v10  ;;  %v483_v62 = vcombine.low %v221_v48, %v225_v52  ;;  %v57_v47 = vld [vmem:[%s903_s1 + $0x3c] sm:$0xf]  ;;  %s720_s1 = smov [#allocation5]  }
  0x2b   :  { %v481_v63 = vrot.slane %v467_v54, %v753_v10  ;;  %v484_v0 = vcombine.low %v229_v55, %v233_v56  ;;  %v241_v1 = vrot.slane %v52_v43, %v744_v6  ;;  %v245_v2 = vrot.slane %v52_v43, %v746_v7  ;;  %s655_s20 = sshll.u32 %s720_s1, 4  ;;  %s656_s20 = int_to_ptr.vmem [resolvable:$true] %s655_s20 }
  0x2c   :  { %640 = vst [vmem:[#allocation5 + $0x30] sm:$0xff] %v624_v59  ;;  %v625_v4 = vadd.f32 %v465_v60, %v33_v53  ;;  %v491_v11 = vrot.slane %v483_v62, %v753_v10  ;;  %v249_v12 = vrot.slane %v52_v43, %v748_v8  ;;  %v253_v13 = vrot.slane %v53_v58, %v742_v5  ;;  %s692_s21 = scalar_lea.vmem %s656_s20, 2048  ;;  %p697_p6 = scmp.lt.s32.totalorder %s656_s20, %s656_s20 }
  0x2d   :  { %v482_v14 = vcombine.low %v474_v61, %v481_v63  ;;  %v498_v15 = vrot.slane %v484_v0, %v753_v10  ;;  %v500_v16 = vcombine.low %v237_v57, %v241_v1  ;;  %v257_v17 = vrot.slane %v53_v58, %v744_v6  ;;  %v38_v57 = vld [vmem:[#allocation2 + $0x60] sm:$0xff]  ;;  %v39_v1 = vld [vmem:[#allocation2 + $0x68] sm:$0xff]  ;;  %p693_p5 = scmp.ne.s32.totalorder %s656_s20, %s692_s21  ;;  %p698_p7 = scmp.lt.s32.totalorder %s692_s21, %s692_s21 }
  0x2e   :  { %641 = vst [vmem:[#allocation5 + $0x38] sm:$0xff] %v625_v4  ;;  %v501_v19 = vcombine.low %v245_v2, %v249_v12  ;;  %v261_v20 = vrot.slane %v53_v58, %v746_v7  ;;  %v265_v21 = vrot.slane %v53_v58, %v748_v8  ;;  %v269_v22 = vrot.slane %v54_v3, %v742_v5 }
  0x2f   :  { %v626_v24 = vadd.f32 %v482_v14, %v34_v9  ;;  %v499_v25 = vcombine.low %v491_v11, %v498_v15  ;;  %v508_v26 = vrot.slane %v500_v16, %v753_v10  ;;  %v517_v27 = vcombine.low %v253_v13, %v257_v17  ;;  %v40_v16 = vld [vmem:[#allocation2 + $0x70] sm:$0xff]  ;;  %p699_p8 = por %p698_p7, %p697_p6 }
  0x30   :  { %v515_v28 = vrot.slane %v501_v19, %v753_v10  ;;  %v518_v29 = vcombine.low %v261_v20, %v265_v21  ;;  %v273_v30 = vrot.slane %v54_v3, %v744_v6  ;;  %v277_v31 = vrot.slane %v54_v3, %v746_v7 }
  0x31   :  { %642 = vst [vmem:[#allocation5 + $0x40] sm:$0xff] %v626_v24  ;;  %v627_v33 = vadd.f32 %v499_v25, %v35_v18  ;;  %v525_v35 = vrot.slane %v517_v27, %v753_v10  ;;  %v281_v36 = vrot.slane %v54_v3, %v748_v8  ;;  %v285_v37 = vrot.slane %v55_v23, %v742_v5  ;;  %p700_p9 = pnand %p699_p8, %p693_p5 }
  0x32   :  { %v516_v38 = vcombine.low %v508_v26, %v515_v28  ;;  %v532_v39 = vrot.slane %v518_v29, %v753_v10  ;;  %v534_v40 = vcombine.low %v269_v22, %v273_v30  ;;  %v289_v41 = vrot.slane %v55_v23, %v744_v6 }
  0x33   :  { %643 = vst [vmem:[#allocation5 + $0x48] sm:$0xff] %v627_v33  ;;  %v535_v43 = vcombine.low %v277_v31, %v281_v36  ;;  %v293_v44 = vrot.slane %v55_v23, %v746_v7  ;;  %v297_v45 = vrot.slane %v55_v23, %v748_v8  ;;  %v301_v46 = vrot.slane %v56_v32, %v742_v5 }
  0x34   :  { %v628_v48 = vadd.f32 %v516_v38, %v36_v34  ;;  %v533_v49 = vcombine.low %v525_v35, %v532_v39  ;;  %v542_v50 = vrot.slane %v534_v40, %v753_v10  ;;  %v551_v51 = vcombine.low %v285_v37, %v289_v41 }
  0x35   :  { %v549_v52 = vrot.slane %v535_v43, %v753_v10  ;;  %v552_v53 = vcombine.low %v293_v44, %v297_v45  ;;  %v305_v54 = vrot.slane %v56_v32, %v744_v6  ;;  %v309_v55 = vrot.slane %v56_v32, %v746_v7 }
  0x36   :  { %644 = vst [vmem:[#allocation5 + $0x50] sm:$0xff] %v628_v48  ;;  %v629_v56 = vadd.f32 %v533_v49, %v37_v42  ;;  %v559_v58 = vrot.slane %v551_v51, %v753_v10  ;;  %v313_v59 = vrot.slane %v56_v32, %v748_v8  ;;  %v317_v60 = vrot.slane %v57_v47, %v742_v5 }
  0x37   :  { %v550_v61 = vcombine.low %v542_v50, %v549_v52  ;;  %v566_v62 = vrot.slane %v552_v53, %v753_v10  ;;  %v568_v63 = vcombine.low %v301_v46, %v305_v54  ;;  %v321_v0 = vrot.slane %v57_v47, %v744_v6 }
  0x38   :  { %645 = vst [vmem:[#allocation5 + $0x58] sm:$0xff] %v629_v56  ;;  %v569_v2 = vcombine.low %v309_v55, %v313_v59  ;;  %v325_v3 = vrot.slane %v57_v47, %v746_v7  ;;  %v329_v4 = vrot.slane %v57_v47, %v748_v8  ;;  %v41_v7 = vld [vmem:[#allocation2 + $0x78] sm:$0xff] }
  0x39   :  { %v630_v9 = vadd.f32 %v550_v61, %v38_v57  ;;  %v567_v11 = vcombine.low %v559_v58, %v566_v62  ;;  %v576_v12 = vrot.slane %v568_v63, %v753_v10  ;;  %v585_v13 = vcombine.low %v317_v60, %v321_v0 }
  0x3a   :  { %v583_v5 = vrot.slane %v569_v2, %v753_v10  ;;  %v586_v14 = vcombine.low %v325_v3, %v329_v4 }
  0x3b   :  { %646 = vst [vmem:[#allocation5 + $0x60] sm:$0xff] %v630_v9  ;;  %v631_v15 = vadd.f32 %v567_v11, %v39_v1  ;;  %v593_v6 = vrot.slane %v585_v13, %v753_v10 }
  0x3c   :  { %v584_v17 = vcombine.low %v576_v12, %v583_v5  ;;  %v600_v18 = vrot.slane %v586_v14, %v753_v10 }
  0x3d   :  { %647 = vst [vmem:[#allocation5 + $0x68] sm:$0xff] %v631_v15 }
  0x3e   :  { %v632_v8 = vadd.f32 %v584_v17, %v40_v16  ;;  %v601_v19 = vcombine.low %v593_v6, %v600_v18 }
  0x40   :  { %648 = vst [vmem:[#allocation5 + $0x70] sm:$0xff] %v632_v8  ;;  %v633_v20 = vadd.f32 %v601_v19, %v41_v7 }
  0x42   :  { %649 = vst [vmem:[#allocation5 + $0x78] sm:$0xff] %v633_v20 }
  0x43   :  { %703 = shalt.err (!%p700_p9)
}
  0x44   :  { %661 = dma.vmem_to_hbm [thread:$0]  %s656_s20, 2048, %s904_s2, [#allocation4], %s717_s12, %s717_s12, %s718_s13  }
  0x45   :  { %714 = dma.done.wait [#allocation4], 2048  }
  0x46   :  { %715 = vsyncadd [#allocation4], 4294965248 }
  0x47   :  { %665 = vsyncpa [#allocation3], 1 }
  0x48   :  { %666 = vsyncpa [#allocation4], 1 }

</bundles_post_ra>
